<compile_context>
chip_gen: v6e
topology: v6e:2x2x1
jax: 0.10.0
libtpu: 0.0.40
codegen_flags: <defaults>
</compile_context>

<pallas_src>
import jax
import jax.numpy as jnp
from jax.experimental import pallas as pl
from jax.experimental.pallas import tpu as pltpu


# ----------------------------- kernels --------------------------------------

def _requ_kernel(x_ref, o_ref):
    # ReQU(x) = max(x**2, 0)
    x = x_ref[...]
    o_ref[...] = jnp.maximum(x * x, 0.0).astype(o_ref.dtype)


def _requr_kernel(x_ref, o_ref):
    # ReQUr(x) = max(x**2, 0) - max((x-0.5)**2, 0)
    x = x_ref[...]
    xm = x - 0.5
    o_ref[...] = (jnp.maximum(x * x, 0.0)
                  - jnp.maximum(xm * xm, 0.0)).astype(o_ref.dtype)


def _requ_requr_fused_kernel(x_ref, a_ref, b_ref):
    # Fused variant: shares the single HBM read of x for both outputs.
    x = x_ref[...]
    xm = x - 0.5
    sq = jnp.maximum(x * x, 0.0)
    a_ref[...] = sq.astype(a_ref.dtype)
    b_ref[...] = (sq - jnp.maximum(xm * xm, 0.0)).astype(b_ref.dtype)


# ----------------------------- jnp fallbacks ---------------------------------
# Used for: misaligned sizes (n % 128 != 0), tiny inputs, unexpected dtypes.
# For a pure elementwise op these are traffic-optimal (1 read + 1 write).

def _requ_jnp(x):
    return jnp.maximum(x * x, 0.0).astype(x.dtype)


def _requr_jnp(x):
    xm = x - 0.5
    return (jnp.maximum(x * x, 0.0) - jnp.maximum(xm * xm, 0.0)).astype(x.dtype)


def _requ_requr_jnp(x):
    return _requ_jnp(x), _requr_jnp(x)


# ----------------------------- tiling plan -----------------------------------

_LANE = 128
_TARGET_BLOCK_BYTES = 4 * 1024 * 1024   # ~4 MiB blocks (v6e/v7x sweet spot per review)
_VMEM_LIMIT_BYTES = 32 * 1024 * 1024    # explicit: covers fused 3-stream double buffering
                                        # (24 MiB) on v5e's 16 MiB default; << v7x 64 MiB.

_SUBLANE = {4: 8, 2: 16, 1: 32}         # minimum sublane multiple per itemsize


def _cdiv(a, b):
    return -(-a // b)


def _round_up(a, b):
    return _cdiv(a, b) * b


def _plan(n, dtype):
    """Return (width, rows, block_rows, grid_steps) or None for the jnp fallback."""
    itemsize = jnp.dtype(dtype).itemsize
    sub = _SUBLANE.get(itemsize)
    if sub is None:
        return None                      # unexpected itemsize (e.g. 8B) -> fallback
    if n % _LANE != 0:
        return None                      # misaligned: avoid pad/slice copies (~2x traffic)
    if n < sub * _LANE:
        return None                      # tiny input: dispatch overhead dominates
    # Widest lane-dense width that divides n exactly (zero-copy reshape) while
    # leaving at least one full sublane group of rows.
    width = _LANE
    for w in (4096, 2048, 1024, 512, 256):
        if n % w == 0 and n // w >= sub:
            width = w
            break
    rows = n // width
    if rows <= sub:
        block_rows = rows                # single minimal block (full-dim block allowed)
    else:
        block_rows = max(sub, (_TARGET_BLOCK_BYTES // (width * itemsize)) // sub * sub)
        # Guarantee >= 2 grid steps so v7x's second TensorCore gets work.
        block_rows = min(block_rows, _round_up(_cdiv(rows, 2), sub))
    grid_steps = _cdiv(rows, block_rows)
    return width, rows, block_rows, grid_steps


def _run_elementwise(kernel_fn, jnp_fn, x, num_outputs=1):
    n = x.size
    plan = _plan(n, x.dtype)
    if plan is None:
        return jnp_fn(x)

    width, rows, block_rows, grid_steps = plan
    x2d = x.reshape(rows, width)         # zero-copy: rows * width == n by construction

    block = pl.BlockSpec((block_rows, width), lambda i: (i, 0))
    out_sds = jax.ShapeDtypeStruct((rows, width), x.dtype)
    if num_outputs == 1:
        out_shape, out_specs = out_sds, block
    else:
        out_shape = (out_sds,) * num_outputs
        out_specs = (block,) * num_outputs

    out = pl.pallas_call(
        kernel_fn,
        out_shape=out_shape,
        grid=(grid_steps,),
        in_specs=[block],
        out_specs=out_specs,
        compiler_params=pltpu.CompilerParams(
            dimension_semantics=("parallel",),
            vmem_limit_bytes=_VMEM_LIMIT_BYTES,
        ),
    )(x2d)

    if num_outputs == 1:
        return out.reshape(x.shape)
    return tuple(o.reshape(x.shape) for o in out)


# ----------------------------- module API ------------------------------------

def loss_nn_forward(x):
    """LossNN.forward(x) == x. Identity: no kernel launch, no HBM traffic."""
    return x


def requ(x):
    """ReQU(x) = max(x**2, 0), as a tiled Pallas TPU kernel."""
    return _run_elementwise(_requ_kernel, _requ_jnp, x)


def requr(x):
    """ReQUr(x) = max(x**2, 0) - max((x-0.5)**2, 0), as a tiled Pallas kernel."""
    return _run_elementwise(_requr_kernel, _requr_jnp, x)


def requ_and_requr(x):
    """Fused ReQU / ReQUr sharing one HBM read of x. Returns (requ, requr)."""
    return _run_elementwise(_requ_requr_fused_kernel, _requ_requr_jnp, x,
                            num_outputs=2)


# TODO(synk): LossNN.criterion / LossNN.predict are abstract (no concrete
# compute defined in the module), so there is nothing to lower for them.

# ------------------------------- main ----------------------------------------

def _refs(x):
    r1 = jnp.maximum(x ** 2, 0.0)
    r2 = r1 - jnp.maximum((x - 0.5) ** 2, 0.0)
    return r1, r2


if __name__ == "__main__":
    key = jax.random.PRNGKey(0)
    k1, k2, k3 = jax.random.split(key, 3)

    # Module-scale NCHW input: batch=2, channels=4, spatial=16x16 (lane-aligned).
    x = jax.random.normal(k1, (2, 4, 16, 16), dtype=jnp.float32)

    # Forward pass (identity) — no copy kernel, no HBM traffic.
    y = jax.block_until_ready(loss_nn_forward(x))
    assert y.shape == x.shape and y.dtype == x.dtype
    assert bool(jnp.all(y == x))

    ref1, ref2 = _refs(x)
    r1 = jax.block_until_ready(requ(x))
    r2 = jax.block_until_ready(requr(x))
    assert r1.shape == x.shape and r2.shape == x.shape
    assert bool(jnp.allclose(r1, ref1, atol=1e-6))
    assert bool(jnp.allclose(r2, ref2, atol=1e-6))

    f1, f2 = requ_and_requr(x)
    f1 = jax.block_until_ready(f1)
    f2 = jax.block_until_ready(f2)
    assert bool(jnp.allclose(f1, ref1, atol=1e-6))
    assert bool(jnp.allclose(f2, ref2, atol=1e-6))

    # Larger lane-aligned input: multi-step grid with a ragged last block
    # (rows=150, block_rows=80 -> 2 grid steps, second block masked writeback).
    w = jax.random.normal(k2, (5, 8, 120, 128), dtype=jnp.float32)
    wref1, wref2 = _refs(w)
    wr1 = jax.block_until_ready(requ(w))
    wr2 = jax.block_until_ready(requr(w))
    wf1, wf2 = requ_and_requr(w)
    wf1 = jax.block_until_ready(wf1)
    wf2 = jax.block_until_ready(wf2)
    assert bool(jnp.allclose(wr1, wref1, atol=1e-6))
    assert bool(jnp.allclose(wr2, wref2, atol=1e-6))
    assert bool(jnp.allclose(wf1, wref1, atol=1e-6))
    assert bool(jnp.allclose(wf2, wref2, atol=1e-6))

    # Misaligned size (n % 128 != 0): exercises the traffic-optimal jnp fallback
    # (no pad/slice round trip).
    z = jax.random.normal(k3, (2, 3, 17, 19), dtype=jnp.float32)
    zref1, zref2 = _refs(z)
    zr1 = jax.block_until_ready(requ(z))
    zr2 = jax.block_until_ready(requr(z))
    assert zr1.shape == z.shape and zr2.shape == z.shape
    assert bool(jnp.allclose(zr1, zref1, atol=1e-6))
    assert bool(jnp.allclose(zr2, zref2, atol=1e-6))

    print("KERNEL_OK")
</pallas_src>

<mosaic_0001>
module attributes {stable_mosaic.version = 11 : i64} {
  func.func @_requ_kernel(%arg0: i32, %arg1: memref<8x256xf32, #tpu.memory_space<vmem>>, %arg2: memref<8x256xf32, #tpu.memory_space<vmem>>) attributes {dimension_semantics = [#tpu.dimension_semantics<parallel>], iteration_bounds = array<i64: 1>, scalar_prefetch = 0 : i64, scratch_operands = 0 : i64, tpu.core_type = #tpu.core_type<tc>, window_params = [{transform_indices = @transform_0, window_bounds = array<i64: 8, 256>}, {transform_indices = @transform_1, window_bounds = array<i64: 8, 256>}]} {
    %c0 = arith.constant 0 : index
    %c0_0 = arith.constant 0 : index
    %0 = vector.load %arg1[%c0, %c0_0] : memref<8x256xf32, #tpu.memory_space<vmem>>, vector<8x256xf32>
    %1 = arith.mulf %0, %0 : vector<8x256xf32>
    %cst = arith.constant 0.000000e+00 : f32
    %2 = vector.broadcast %cst : f32 to vector<8x256xf32>
    %3 = arith.maximumf %1, %2 : vector<8x256xf32>
    %c0_1 = arith.constant 0 : index
    %c0_2 = arith.constant 0 : index
    %4 = vector.load %arg2[%c0_1, %c0_2] : memref<8x256xf32, #tpu.memory_space<vmem>>, vector<8x256xf32>
    tpu.vector_store %arg2[%c0_1, %c0_2], %3 {strides = array<i32>} : memref<8x256xf32, #tpu.memory_space<vmem>>, vector<8x256xf32>,
    return
  }
  func.func @transform_0(%arg0: i32) -> (i32, i32) {
    %c0_i32 = arith.constant 0 : i32
    %c0_i32_0 = arith.constant 0 : i32
    return %arg0, %c0_i32 : i32, i32
  }
  func.func @transform_1(%arg0: i32) -> (i32, i32) {
    %c0_i32 = arith.constant 0 : i32
    %c0_i32_0 = arith.constant 0 : i32
    return %arg0, %c0_i32 : i32, i32
  }
}

</mosaic_0001>

<bundles_post_ra>
// kernel: tpu_custom_call.1
= control target key start
LH: loop header
LB: loop body
LE: loop exit
PB: predicated region body
PF: predicated region fallthrough
CT: control target
= control target key end

     0   :  { %6 = vsyncpa [#allocation3], 0  ;;  %s108_s0 = inlined_call_operand.hbm [shape: f32[8,256], index: 0, kind: input, shape index: {}]   ;;  %s109_s1 = inlined_call_operand.hbm [shape: f32[8,256], index: 1, kind: output, shape index: {}]  }
   0x1   :  { %7 = vsyncpa [#allocation4], 0  ;;  %s90_s6 = smov [#allocation2]  }
   0x2   :  { %s14_s7 = sshll.u32 %s90_s6, 4  ;;  %s15_s7 = int_to_ptr.vmem [resolvable:$true] %s14_s7 }
   0x3   :  { %s54_s8 = scalar_lea.vmem %s15_s7, 256  ;;  %p59_p1 = scmp.lt.s32.totalorder %s15_s7, %s15_s7 }
   0x4   :  { %p55_p0 = scmp.ne.s32.totalorder %s15_s7, %s54_s8  ;;  %p60_p2 = scmp.lt.s32.totalorder %s54_s8, %s54_s8 }
   0x6   :  { %p61_p3 = por %p60_p2, %p59_p1 }
   0x8   :  { %p62_p4 = pnand %p61_p3, %p55_p0 }
   0xa   :  { %65 = shalt.err (!%p62_p4)
}
   0xb   :  { %17 = dma.hbm_to_vmem [thread:$0]  %s108_s0, 256, %s15_s7, [#allocation3]  }
   0xc   :  { %86 = dma.done.wait [#allocation3], 256  }
   0xd   :  { %87 = vsyncadd [#allocation3], 4294967040  ;;  %v21_v0 = vld [vmem:[#allocation2] sm:$0xff]  ;;  %v22_v1 = vld [vmem:[#allocation2 + $0x8] sm:$0xff]  ;;  %s91_s11 = smov [#allocation5]  }
   0xe   :  { %s35_s12 = sshll.u32 %s91_s11, 4  ;;  %v23_v2 = vmul.f32 %v21_v0, %v21_v0  ;;  %v24_v3 = vmul.f32 %v22_v1, %v22_v1  ;;  %s36_s12 = int_to_ptr.vmem [resolvable:$true] %s35_s12 }
   0xf   :  { %s66_s13 = scalar_lea.vmem %s36_s12, 256  ;;  %p71_p6 = scmp.lt.s32.totalorder %s36_s12, %s36_s12 }
  0x10   :  { %v25_v4 = vmax.f32 %v23_v2, 0.0  ;;  %v26_v5 = vmax.f32 %v24_v3, 0.0  ;;  %p67_p5 = scmp.ne.s32.totalorder %s36_s12, %s66_s13  ;;  %p72_p7 = scmp.lt.s32.totalorder %s66_s13, %s66_s13 }
  0x12   :  { %27 = vst [vmem:[#allocation5] sm:$0xff] %v25_v4  ;;  %28 = vst [vmem:[#allocation5 + $0x8] sm:$0xff] %v26_v5  ;;  %p73_p8 = por %p72_p7, %p71_p6 }
  0x14   :  { %p74_p9 = pnand %p73_p8, %p67_p5 }
  0x16   :  { %77 = shalt.err (!%p74_p9)
}
  0x17   :  { %38 = dma.vmem_to_hbm [thread:$0]  %s36_s12, 256, %s109_s1, [#allocation4]  }
  0x18   :  { %88 = dma.done.wait [#allocation4], 256  }
  0x19   :  { %89 = vsyncadd [#allocation4], 4294967040 }
  0x1a   :  { %42 = vsyncpa [#allocation3], 1 }
  0x1b   :  { %43 = vsyncpa [#allocation4], 1 }

</bundles_post_ra>
